<compile_context>
chip_gen: v7x
topology: tpu7x:2x2x1
jax: 0.10.0
libtpu: 0.0.40
codegen_flags: <defaults>
</compile_context>

<pallas_src>
import jax
import jax.numpy as jnp
from jax.experimental import pallas as pl
from jax.experimental.pallas import tpu as pltpu


IN_DIM = 28 * 28   # 784
H1 = 300
H2 = 100
OUT_DIM = 10

# Lane-padded (multiple-of-128) sizes used inside the kernel.
IN_PAD = 896       # 7 * 128
H1_PAD = 384       # 3 * 128
H2_PAD = 128       # 1 * 128
OUT_PAD = 128      # 1 * 128

MAX_TILE_B = 512   # batch tile (multiple of 8); amortizes per-step overhead


def _round_up(x, m):
    return (x + m - 1) // m * m


def lenet_kernel(x_ref, w1_ref, b1_ref, w2_ref, b2_ref, w3_ref, b3_ref, o_ref):
    # fc1 + ReLU   (bf16 matmul, f32 accumulate, f32 epilogue)
    h1 = jnp.dot(x_ref[...], w1_ref[...], preferred_element_type=jnp.float32)
    h1 = jnp.maximum(h1 + b1_ref[...], 0.0).astype(jnp.bfloat16)
    # fc2 + ReLU
    h2 = jnp.dot(h1, w2_ref[...], preferred_element_type=jnp.float32)
    h2 = jnp.maximum(h2 + b2_ref[...], 0.0).astype(jnp.bfloat16)
    # fc3 (no activation)
    out = jnp.dot(h2, w3_ref[...], preferred_element_type=jnp.float32) + b3_ref[...]
    o_ref[...] = out.astype(o_ref.dtype)


def lenet_300_100_forward(x, packed_params):
    """x: any shape whose trailing dims flatten to 784 (e.g. (B,1,28,28)).

    packed_params: output of `pack_params` (lane-padded bf16 weights, f32 biases).
    Returns (B, 10) float32 logits.
    """
    w1, b1, w2, b2, w3, b3 = packed_params
    x2 = x.reshape(-1, IN_DIM).astype(jnp.float32)
    B = x2.shape[0]

    tile_b = min(MAX_TILE_B, _round_up(B, 8))
    b_pad = _round_up(B, tile_b)

    # Zero-pad batch and feature dims once in the wrapper; cast x tile to bf16.
    xp = jnp.zeros((b_pad, IN_PAD), jnp.bfloat16)
    xp = xp.at[:B, :IN_DIM].set(x2.astype(jnp.bfloat16))

    grid = (b_pad // tile_b,)

    flops = 2 * b_pad * (IN_PAD * H1_PAD + H1_PAD * H2_PAD + H2_PAD * OUT_PAD)
    bytes_accessed = (
        xp.size * 2                                   # bf16 input
        + b_pad * OUT_PAD * 4                         # f32 output
        + (w1.size + w2.size + w3.size) * 2           # bf16 weights
        + (b1.size + b2.size + b3.size) * 4           # f32 biases
    )

    out = pl.pallas_call(
        lenet_kernel,
        out_shape=jax.ShapeDtypeStruct((b_pad, OUT_PAD), jnp.float32),
        grid_spec=pltpu.PrefetchScalarGridSpec(
            num_scalar_prefetch=0,
            grid=grid,
            in_specs=[
                pl.BlockSpec((tile_b, IN_PAD), lambda i: (i, 0)),   # x tile
                pl.BlockSpec((IN_PAD, H1_PAD), lambda i: (0, 0)),   # w1 (resident)
                pl.BlockSpec((1, H1_PAD), lambda i: (0, 0)),        # b1
                pl.BlockSpec((H1_PAD, H2_PAD), lambda i: (0, 0)),   # w2
                pl.BlockSpec((1, H2_PAD), lambda i: (0, 0)),        # b2
                pl.BlockSpec((H2_PAD, OUT_PAD), lambda i: (0, 0)),  # w3
                pl.BlockSpec((1, OUT_PAD), lambda i: (0, 0)),       # b3
            ],
            out_specs=pl.BlockSpec((tile_b, OUT_PAD), lambda i: (i, 0)),
        ),
        compiler_params=pltpu.CompilerParams(
            dimension_semantics=("parallel",),
            vmem_limit_bytes=32 * 1024 * 1024,
        ),
        cost_estimate=pl.CostEstimate(
            flops=flops, transcendentals=0, bytes_accessed=bytes_accessed),
    )(xp, w1, b1, w2, b2, w3, b3)

    return out[:B, :OUT_DIM]


def init_params(key):
    """nn.Linear-style init U(-1/sqrt(fan_in), 1/sqrt(fan_in)).

    Weights are (in, out) f32 (already transposed for `x @ W`), biases (1, out).
    """
    keys = jax.random.split(key, 6)

    def linear(kw, kb, fan_in, fan_out):
        bound = 1.0 / jnp.sqrt(float(fan_in))
        w = jax.random.uniform(kw, (fan_in, fan_out), jnp.float32, -bound, bound)
        b = jax.random.uniform(kb, (1, fan_out), jnp.float32, -bound, bound)
        return w, b

    w1, b1 = linear(keys[0], keys[1], IN_DIM, H1)
    w2, b2 = linear(keys[2], keys[3], H1, H2)
    w3, b3 = linear(keys[4], keys[5], H2, OUT_DIM)
    return (w1, b1, w2, b2, w3, b3)


def pack_params(params):
    """Zero-pad lane dims to multiples of 128; weights -> bf16, biases -> f32."""
    w1, b1, w2, b2, w3, b3 = params

    def pad_w(w, rows, cols):
        wp = jnp.zeros((rows, cols), jnp.float32).at[:w.shape[0], :w.shape[1]].set(w)
        return wp.astype(jnp.bfloat16)

    def pad_b(b, cols):
        return jnp.zeros((1, cols), jnp.float32).at[:, :b.shape[1]].set(b)

    return (pad_w(w1, IN_PAD, H1_PAD), pad_b(b1, H1_PAD),
            pad_w(w2, H1_PAD, H2_PAD), pad_b(b2, H2_PAD),
            pad_w(w3, H2_PAD, OUT_PAD), pad_b(b3, OUT_PAD))


def _reference_forward_f32(x, params):
    """Pure f32 reference (PyTorch semantics)."""
    w1, b1, w2, b2, w3, b3 = params
    x2 = x.reshape(-1, IN_DIM).astype(jnp.float32)
    hi = jax.lax.Precision.HIGHEST
    h1 = jnp.maximum(jnp.dot(x2, w1, precision=hi) + b1, 0.0)
    h2 = jnp.maximum(jnp.dot(h1, w2, precision=hi) + b2, 0.0)
    return jnp.dot(h2, w3, precision=hi) + b3


def _reference_forward_bf16(x, params):
    """Reference that emulates the kernel's bf16-input / f32-accumulate recipe."""
    w1, b1, w2, b2, w3, b3 = params
    rt = lambda a: a.astype(jnp.bfloat16).astype(jnp.float32)  # bf16 round-trip
    hi = jax.lax.Precision.HIGHEST
    x2 = rt(x.reshape(-1, IN_DIM).astype(jnp.float32))
    h1 = rt(jnp.maximum(jnp.dot(x2, rt(w1), precision=hi) + b1, 0.0))
    h2 = rt(jnp.maximum(jnp.dot(h1, rt(w2), precision=hi) + b2, 0.0))
    return jnp.dot(h2, rt(w3), precision=hi) + b3


if __name__ == "__main__":
    key = jax.random.PRNGKey(0)
    k_params, k_x = jax.random.split(key)

    params = init_params(k_params)
    packed = pack_params(params)

    # Small batch of MNIST-shaped inputs (NCHW) — forward flattens to (B, 784).
    x = jax.random.normal(k_x, (2, 1, 28, 28), dtype=jnp.float32)

    out = lenet_300_100_forward(x, packed)
    out = jax.block_until_ready(out)
    assert out.shape == (2, OUT_DIM), out.shape

    # Tight check against a reference using the same bf16/f32-accum numerics.
    ref_bf16 = _reference_forward_bf16(x, params)
    assert jnp.allclose(out, ref_bf16, atol=1e-3, rtol=1e-3), "mismatch vs bf16-emulating reference"

    # Loose check against the pure-f32 PyTorch-semantics reference.
    ref_f32 = _reference_forward_f32(x, params)
    assert jnp.allclose(out, ref_f32, atol=5e-2, rtol=5e-2), "mismatch vs f32 reference"

    print("KERNEL_OK")
</pallas_src>

<mosaic_0001>
module attributes {stable_mosaic.version = 11 : i64} {
  func.func @lenet_kernel(%arg0: i32, %arg1: memref<8x896xbf16, #tpu.memory_space<vmem>>, %arg2: memref<896x384xbf16, #tpu.memory_space<vmem>>, %arg3: memref<1x384xf32, #tpu.memory_space<vmem>>, %arg4: memref<384x128xbf16, #tpu.memory_space<vmem>>, %arg5: memref<1x128xf32, #tpu.memory_space<vmem>>, %arg6: memref<128x128xbf16, #tpu.memory_space<vmem>>, %arg7: memref<1x128xf32, #tpu.memory_space<vmem>>, %arg8: memref<8x128xf32, #tpu.memory_space<vmem>>) attributes {dimension_semantics = [#tpu.dimension_semantics<parallel>], iteration_bounds = array<i64: 1>, scalar_prefetch = 0 : i64, scratch_operands = 0 : i64, tpu.core_type = #tpu.core_type<tc>, window_params = [{transform_indices = @transform_0, window_bounds = array<i64: 8, 896>}, {pipeline_mode = #tpu.pipeline_mode<synchronous>, transform_indices = @transform_1, window_bounds = array<i64: 896, 384>}, {pipeline_mode = #tpu.pipeline_mode<synchronous>, transform_indices = @transform_2, window_bounds = array<i64: 1, 384>}, {pipeline_mode = #tpu.pipeline_mode<synchronous>, transform_indices = @transform_3, window_bounds = array<i64: 384, 128>}, {pipeline_mode = #tpu.pipeline_mode<synchronous>, transform_indices = @transform_4, window_bounds = array<i64: 1, 128>}, {pipeline_mode = #tpu.pipeline_mode<synchronous>, transform_indices = @transform_5, window_bounds = array<i64: 128, 128>}, {pipeline_mode = #tpu.pipeline_mode<synchronous>, transform_indices = @transform_6, window_bounds = array<i64: 1, 128>}, {transform_indices = @transform_7, window_bounds = array<i64: 8, 128>}]} {
    %c0 = arith.constant 0 : index
    %c0_0 = arith.constant 0 : index
    %0 = vector.load %arg1[%c0, %c0_0] : memref<8x896xbf16, #tpu.memory_space<vmem>>, vector<8x896xbf16>
    %c0_1 = arith.constant 0 : index
    %c0_2 = arith.constant 0 : index
    %1 = vector.load %arg2[%c0_1, %c0_2] : memref<896x384xbf16, #tpu.memory_space<vmem>>, vector<896x384xbf16>
    %cst = arith.constant dense<0.000000e+00> : vector<8x384xf32>
    %2 = tpu.matmul %0, %1, %cst {dimension_numbers = #tpu.dot_dimension_numbers<[1], [0], [0], [1], [0, 0, 1, 1], [], []>} : vector<8x896xbf16>, vector<896x384xbf16>, vector<8x384xf32> -> vector<8x384xf32>
    %c0_3 = arith.constant 0 : index
    %c0_4 = arith.constant 0 : index
    %3 = vector.load %arg3[%c0_3, %c0_4] : memref<1x384xf32, #tpu.memory_space<vmem>>, vector<1x384xf32>
    %4 = vector.broadcast %3 : vector<1x384xf32> to vector<8x384xf32>
    %5 = arith.addf %2, %4 : vector<8x384xf32>
    %cst_5 = arith.constant 0.000000e+00 : f32
    %6 = vector.broadcast %cst_5 : f32 to vector<8x384xf32>
    %7 = arith.maximumf %5, %6 : vector<8x384xf32>
    %8 = arith.truncf %7 : vector<8x384xf32> to vector<8x384xbf16>
    %c0_6 = arith.constant 0 : index
    %c0_7 = arith.constant 0 : index
    %9 = vector.load %arg4[%c0_6, %c0_7] : memref<384x128xbf16, #tpu.memory_space<vmem>>, vector<384x128xbf16>
    %cst_8 = arith.constant dense<0.000000e+00> : vector<8x128xf32>
    %10 = tpu.matmul %8, %9, %cst_8 {dimension_numbers = #tpu.dot_dimension_numbers<[1], [0], [0], [1], [0, 0, 1, 1], [], []>} : vector<8x384xbf16>, vector<384x128xbf16>, vector<8x128xf32> -> vector<8x128xf32>
    %c0_9 = arith.constant 0 : index
    %c0_10 = arith.constant 0 : index
    %11 = vector.load %arg5[%c0_9, %c0_10] : memref<1x128xf32, #tpu.memory_space<vmem>>, vector<1x128xf32>
    %12 = vector.broadcast %11 : vector<1x128xf32> to vector<8x128xf32>
    %13 = arith.addf %10, %12 : vector<8x128xf32>
    %cst_11 = arith.constant 0.000000e+00 : f32
    %14 = vector.broadcast %cst_11 : f32 to vector<8x128xf32>
    %15 = arith.maximumf %13, %14 : vector<8x128xf32>
    %16 = arith.truncf %15 : vector<8x128xf32> to vector<8x128xbf16>
    %c0_12 = arith.constant 0 : index
    %c0_13 = arith.constant 0 : index
    %17 = vector.load %arg6[%c0_12, %c0_13] : memref<128x128xbf16, #tpu.memory_space<vmem>>, vector<128x128xbf16>
    %cst_14 = arith.constant dense<0.000000e+00> : vector<8x128xf32>
    %18 = tpu.matmul %16, %17, %cst_14 {dimension_numbers = #tpu.dot_dimension_numbers<[1], [0], [0], [1], [0, 0, 1, 1], [], []>} : vector<8x128xbf16>, vector<128x128xbf16>, vector<8x128xf32> -> vector<8x128xf32>
    %c0_15 = arith.constant 0 : index
    %c0_16 = arith.constant 0 : index
    %19 = vector.load %arg7[%c0_15, %c0_16] : memref<1x128xf32, #tpu.memory_space<vmem>>, vector<1x128xf32>
    %20 = vector.broadcast %19 : vector<1x128xf32> to vector<8x128xf32>
    %21 = arith.addf %18, %20 : vector<8x128xf32>
    %c0_17 = arith.constant 0 : index
    %c0_18 = arith.constant 0 : index
    %22 = vector.load %arg8[%c0_17, %c0_18] : memref<8x128xf32, #tpu.memory_space<vmem>>, vector<8x128xf32>
    tpu.vector_store %arg8[%c0_17, %c0_18], %21 {strides = array<i32>} : memref<8x128xf32, #tpu.memory_space<vmem>>, vector<8x128xf32>,
    return
  }
  func.func @transform_0(%arg0: i32) -> (i32, i32) {
    %c0_i32 = arith.constant 0 : i32
    %c0_i32_0 = arith.constant 0 : i32
    return %arg0, %c0_i32 : i32, i32
  }
  func.func @transform_1(%arg0: i32) -> (i32, i32) {
    %c0_i32 = arith.constant 0 : i32
    %c0_i32_0 = arith.constant 0 : i32
    %c0_i32_1 = arith.constant 0 : i32
    return %c0_i32, %c0_i32_0 : i32, i32
  }
  func.func @transform_2(%arg0: i32) -> (i32, i32) {
    %c0_i32 = arith.constant 0 : i32
    %c0_i32_0 = arith.constant 0 : i32
    %c0_i32_1 = arith.constant 0 : i32
    return %c0_i32, %c0_i32_0 : i32, i32
  }
  func.func @transform_3(%arg0: i32) -> (i32, i32) {
    %c0_i32 = arith.constant 0 : i32
    %c0_i32_0 = arith.constant 0 : i32
    %c0_i32_1 = arith.constant 0 : i32
    return %c0_i32, %c0_i32_0 : i32, i32
  }
  func.func @transform_4(%arg0: i32) -> (i32, i32) {
    %c0_i32 = arith.constant 0 : i32
    %c0_i32_0 = arith.constant 0 : i32
    %c0_i32_1 = arith.constant 0 : i32
    return %c0_i32, %c0_i32_0 : i32, i32
  }
  func.func @transform_5(%arg0: i32) -> (i32, i32) {
    %c0_i32 = arith.constant 0 : i32
    %c0_i32_0 = arith.constant 0 : i32
    %c0_i32_1 = arith.constant 0 : i32
    return %c0_i32, %c0_i32_0 : i32, i32
  }
  func.func @transform_6(%arg0: i32) -> (i32, i32) {
    %c0_i32 = arith.constant 0 : i32
    %c0_i32_0 = arith.constant 0 : i32
    %c0_i32_1 = arith.constant 0 : i32
    return %c0_i32, %c0_i32_0 : i32, i32
  }
  func.func @transform_7(%arg0: i32) -> (i32, i32) {
    %c0_i32 = arith.constant 0 : i32
    %c0_i32_0 = arith.constant 0 : i32
    return %arg0, %c0_i32 : i32, i32
  }
}

</mosaic_0001>

<bundles_post_ra>
// kernel: tpu_custom_call.1
= control target key start
LH: loop header
LB: loop body
LE: loop exit
PB: predicated region body
PF: predicated region fallthrough
CT: control target
= control target key end

     0   :  { %12 = vsyncpa [#allocation3], 0  ;;  %s2945_s0 = inlined_call_operand.hbm [shape: bf16[8,896], index: 0, kind: input, shape index: {}]   ;;  %s2946_s1 = inlined_call_operand.hbm [shape: bf16[896,384], index: 1, kind: input, shape index: {}]   ;;  %s2947_s2 = inlined_call_operand.vmem [shape: f32[1,384], index: 2, kind: input, shape index: {}]   ;;  %s2948_s3 = inlined_call_operand.hbm [shape: bf16[384,128], index: 3, kind: input, shape index: {}]   ;;  %s2949_s4 = inlined_call_operand.vmem [shape: f32[1,128], index: 4, kind: input, shape index: {}]   ;;  %s2950_s5 = inlined_call_operand.hbm [shape: bf16[128,128], index: 5, kind: input, shape index: {}]   ;;  %s2951_s6 = inlined_call_operand.vmem [shape: f32[1,128], index: 6, kind: input, shape index: {}]   ;;  %s2952_s7 = inlined_call_operand.hbm [shape: f32[8,128], index: 7, kind: output, shape index: {}]  }
   0x1   :  { %13 = vsyncpa [#allocation6], 0 }
   0x2   :  { %14 = vsyncpa [#allocation9], 0 }
   0x3   :  { %15 = vsyncpa [#allocation4], 0  ;;  %s2778_s24 = smov [#allocation5]   ;;  %s2660_s28 = scalar_lea.hbm %s2946_s1, 21504 }
   0x4   :  { %s31_s25 = sshll.u32 %s2778_s24, 4  ;;  %p2661_p0 = scmp.ne.s32.totalorder %s2946_s1, %s2660_s28  ;;  %s32_s25 = int_to_ptr.vmem [resolvable:$true] %s31_s25 }
   0x5   :  { %p2664_p1 = scmp.lt.u32.totalorder %s2660_s28, %s2946_s1 }
   0x7   :  { %p2666_p2 = pnand %p2664_p1, %p2661_p0 }
   0x9   :  { %2669 = shalt.err (!%p2666_p2)
}
   0xa   :  { %s2670_s10 = scalar_lea.vmem %s32_s25, 21504  ;;  %p2675_p4 = scmp.lt.s32.totalorder %s32_s25, %s32_s25 }
   0xb   :  { %p2671_p3 = scmp.ne.s32.totalorder %s32_s25, %s2670_s10  ;;  %p2676_p5 = scmp.lt.s32.totalorder %s2670_s10, %s2670_s10 }
   0xd   :  { %p2677_p6 = por %p2676_p5, %p2675_p4 }
   0xf   :  { %p2678_p7 = pnand %p2677_p6, %p2671_p3 }
  0x11   :  { %2681 = shalt.err (!%p2678_p7)
}
  0x12   :  { %s2779_s11 = smov 192   ;;  %s2780_s12 = smov 12  }
  0x13   :  { %37 = dma.hbm_to_vmem [thread:$0]  %s2946_s1, 21504, %s32_s25, [#allocation6], %s2779_s11, %s2779_s11, %s2780_s12  }
  0x14   :  { %s2781_s15 = smov [#allocation2]   ;;  %s2782_s17 = smov [#allocation7]  }
  0x15   :  { %s22_s16 = sshll.u32 %s2781_s15, 4  ;;  %s45_s18 = sshll.u32 %s2782_s17, 4  ;;  %s23_s16 = int_to_ptr.vmem [resolvable:$true] %s22_s16  ;;  %s46_s18 = int_to_ptr.vmem [resolvable:$true] %s45_s18 }
  0x16   :  { %s2682_s21 = scalar_lea.hbm %s2945_s0, 448 }
  0x17   :  { %p2683_p8 = scmp.ne.s32.totalorder %s2945_s0, %s2682_s21  ;;  %p2686_p9 = scmp.lt.u32.totalorder %s2682_s21, %s2945_s0 }
  0x19   :  { %p2688_p10 = pnand %p2686_p9, %p2683_p8 }
  0x1b   :  { %2691 = shalt.err (!%p2688_p10)
}
  0x1c   :  { %s2692_s1 = scalar_lea.vmem %s23_s16, 448  ;;  %p2697_p12 = scmp.lt.s32.totalorder %s23_s16, %s23_s16 }
  0x1d   :  { %p2693_p11 = scmp.ne.s32.totalorder %s23_s16, %s2692_s1  ;;  %p2698_p13 = scmp.lt.s32.totalorder %s2692_s1, %s2692_s1 }
  0x1f   :  { %p2699_p0 = por %p2698_p13, %p2697_p12 }
  0x21   :  { %p2700_p1 = pnand %p2699_p0, %p2693_p11 }
  0x23   :  { %2703 = shalt.err (!%p2700_p1)
}
  0x24   :  { %25 = dma.hbm_to_vmem [thread:$0]  %s2945_s0, 448, %s23_s16, [#allocation3]  }
  0x25   :  { %s2704_s30 = scalar_lea.hbm %s2948_s3, 3072 }
  0x26   :  { %p2705_p2 = scmp.ne.s32.totalorder %s2948_s3, %s2704_s30  ;;  %p2708_p3 = scmp.lt.u32.totalorder %s2704_s30, %s2948_s3 }
  0x28   :  { %p2710_p4 = pnand %p2708_p3, %p2705_p2 }
  0x2a   :  { %2713 = shalt.err (!%p2710_p4)
}
  0x2b   :  { %s2714_s12 = scalar_lea.vmem %s46_s18, 3072  ;;  %p2719_p6 = scmp.lt.s32.totalorder %s46_s18, %s46_s18 }
  0x2c   :  { %p2715_p5 = scmp.ne.s32.totalorder %s46_s18, %s2714_s12  ;;  %p2720_p7 = scmp.lt.s32.totalorder %s2714_s12, %s2714_s12 }
  0x2e   :  { %p2721_p8 = por %p2720_p7, %p2719_p6 }
  0x30   :  { %p2722_p9 = pnand %p2721_p8, %p2715_p5 }
  0x32   :  { %2725 = shalt.err (!%p2722_p9)
}
  0x33   :  { %s2783_s0 = smov 64   ;;  %s2784_s13 = smov 4  }
  0x34   :  { %51 = dma.hbm_to_vmem [thread:$0]  %s2948_s3, 3072, %s46_s18, [#allocation6], %s2783_s0, %s2783_s0, %s2784_s13  }
  0x35   :  { %s2785_s16 = smov [#allocation8]   ;;  %s2726_s21 = scalar_lea.hbm %s2950_s5, 1024 }
  0x36   :  { %s59_s17 = sshll.u32 %s2785_s16, 4  ;;  %p2727_p10 = scmp.ne.s32.totalorder %s2950_s5, %s2726_s21  ;;  %s60_s17 = int_to_ptr.vmem [resolvable:$true] %s59_s17 }
  0x37   :  { %p2730_p11 = scmp.lt.u32.totalorder %s2726_s21, %s2950_s5 }
  0x39   :  { %p2732_p12 = pnand %p2730_p11, %p2727_p10 }
  0x3b   :  { %2735 = shalt.err (!%p2732_p12)
}
  0x3c   :  { %s2736_s1 = scalar_lea.vmem %s60_s17, 1024  ;;  %p2741_p0 = scmp.lt.s32.totalorder %s60_s17, %s60_s17 }
  0x3d   :  { %p2737_p13 = scmp.ne.s32.totalorder %s60_s17, %s2736_s1  ;;  %p2742_p1 = scmp.lt.s32.totalorder %s2736_s1, %s2736_s1 }
  0x3f   :  { %p2743_p2 = por %p2742_p1, %p2741_p0 }
  0x41   :  { %p2744_p3 = pnand %p2743_p2, %p2737_p13 }
  0x43   :  { %2747 = shalt.err (!%p2744_p3)
}
  0x44   :  { %65 = dma.hbm_to_vmem [thread:$0]  %s2950_s5, 1024, %s60_s17, [#allocation9], %s2783_s0, %s2783_s0, %s2784_s13  }
  0x45   :  { %2770 = dma.done.wait [#allocation3], 448  }
  0x46   :  { %2771 = vsyncadd [#allocation3], 4294966848 }
  0x47   :  { %2772 = dma.done.wait [#allocation6], 24576  }
  0x48   :  { %2773 = vsyncadd [#allocation6], 4294942720 }
  0x49   :  { %2774 = dma.done.wait [#allocation9], 1024  }
  0x4a   :  { %2775 = vsyncadd [#allocation9], 4294966272  ;;  %v2397_v0 = vld [vmem:[#allocation5 + $0x4] ss:$12 sps:$4 sm:$0xff]   ;;  %v2399_v1 = vld [vmem:[#allocation5] ss:$12 sps:$4 sm:$0xff]  }
  0x4b   :  { %1247 = vmatprep.subr.bf16.mxu0 %v2397_v0  ;;  %v2400_v2 = vld [vmem:[#allocation5 + $0x1c] ss:$12 sps:$4 sm:$0xff]   ;;  %v2402_v3 = vld [vmem:[#allocation5 + $0x18] ss:$12 sps:$4 sm:$0xff]   ;;  %v2403_v4 = vld [vmem:[#allocation5 + $0x34] ss:$12 sps:$4 sm:$0xff]  }
  0x4c   :  { %1248 = vmatpush1.bf16.msra.mxu0 %v2399_v1  ;;  %v2405_v5 = vld [vmem:[#allocation5 + $0x30] ss:$12 sps:$4 sm:$0xff]   ;;  %v2406_v6 = vld [vmem:[#allocation5 + $0x4c] ss:$12 sps:$4 sm:$0xff]   ;;  %v2408_v7 = vld [vmem:[#allocation5 + $0x48] ss:$12 sps:$4 sm:$0xff]  }
  0x4d   :  { %1249 = vmatprep.subr.bf16.mxu0 %v2400_v2  ;;  %v2409_v8 = vld [vmem:[#allocation5 + $0x64] ss:$12 sps:$4 sm:$0xff]   ;;  %v2411_v9 = vld [vmem:[#allocation5 + $0x60] ss:$12 sps:$4 sm:$0xff]   ;;  %v2412_v10 = vld [vmem:[#allocation5 + $0x7c] ss:$12 sps:$4 sm:$0xff]  }
  0x4e   :  { %v2430_v11 = vld [vmem:[#allocation5 + $0xc8] ss:$12 sps:$4 sm:$0xff]   ;;  %v2414_v13 = vld [vmem:[#allocation5 + $0x78] ss:$12 sps:$4 sm:$0xff]   ;;  %v2435_v14 = vld [vmem:[#allocation5 + $0xe0] ss:$12 sps:$4 sm:$0xff]  }
  0x4f   :  { %v2431_v12 = vld [vmem:[#allocation5 + $0x8] ss:$12 sps:$4 sm:$0xff]   ;;  %2196 = vmatprep.subr.bf16.mxu1 %v2430_v11  ;;  %v2436_v15 = vld [vmem:[#allocation5 + $0x20] ss:$12 sps:$4 sm:$0xff]   ;;  %v2417_v17 = vld [vmem:[#allocation5 + $0x90] ss:$12 sps:$4 sm:$0xff]  }
  0x50   :  { %1250 = vmatpush1.bf16.msra.mxu0 %v2402_v3  ;;  %2197 = vmatpush3.bf16.msra.mxu1 %v2431_v12  ;;  %v2415_v16 = vld [vmem:[#allocation5 + $0x94] ss:$12 sps:$4 sm:$0xff]   ;;  %v2440_v18 = vld [vmem:[#allocation5 + $0xf8] ss:$12 sps:$4 sm:$0xff]   ;;  %v2445_v21 = vld [vmem:[#allocation5 + $0x110] ss:$12 sps:$4 sm:$0xff]  }
  0x51   :  { %1251 = vmatprep.subr.bf16.mxu0 %v2403_v4  ;;  %2198 = vmatprep.subr.bf16.mxu1 %v2435_v14  ;;  %v2441_v19 = vld [vmem:[#allocation5 + $0x38] ss:$12 sps:$4 sm:$0xff]   ;;  %v2446_v22 = vld [vmem:[#allocation5 + $0x50] ss:$12 sps:$4 sm:$0xff]   ;;  %v2420_v23 = vld [vmem:[#allocation5 + $0xa8] ss:$12 sps:$4 sm:$0xff]  }
  0x52   :  { %v2418_v20 = vld [vmem:[#allocation5 + $0xac] ss:$12 sps:$4 sm:$0xff]   ;;  %v2421_v24 = vld [vmem:[#allocation5 + $0xc4] ss:$12 sps:$4 sm:$0xff]   ;;  %v2450_v25 = vld [vmem:[#allocation5 + $0x128] ss:$12 sps:$4 sm:$0xff]  }
  0x53   :  { %v2423_v26 = vld [vmem:[#allocation5 + $0xc0] ss:$12 sps:$4 sm:$0xff]   ;;  %v2451_v27 = vld [vmem:[#allocation5 + $0x68] ss:$12 sps:$4 sm:$0xff]   ;;  %v2426_v31 = vld [vmem:[#allocation5 + $0xd8] ss:$12 sps:$4 sm:$0xff]  }
  0x54   :  { %1252 = vmatpush1.bf16.msra.mxu0 %v2405_v5  ;;  %2199 = vmatpush3.bf16.msra.mxu1 %v2436_v15  ;;  %v2424_v28 = vld [vmem:[#allocation5 + $0xdc] ss:$12 sps:$4 sm:$0xff]   ;;  %v2455_v29 = vld [vmem:[#allocation5 + $0x140] ss:$12 sps:$4 sm:$0xff]   ;;  %v2462_v34 = vld [vmem:[#allocation5 + $0x158] ss:$12 sps:$4 sm:$0xff]  }
  0x55   :  { %1253 = vmatprep.subr.bf16.mxu0 %v2406_v6  ;;  %2200 = vmatprep.subr.bf16.mxu1 %v2440_v18  ;;  %v81_v30 = vld [vmem:[#allocation2] sm:$0xff]  ;;  %v2456_v32 = vld [vmem:[#allocation5 + $0x80] ss:$12 sps:$4 sm:$0xff]   ;;  %v2429_v36 = vld [vmem:[#allocation5 + $0xf0] ss:$12 sps:$4 sm:$0xff]   ;;  %vm2787_vm0 = vmmov 0  }
  0x56   :  { %v1988_v33 = vcombine.high %v81_v30, %v81_v30  ;;  %v2427_v35 = vld [vmem:[#allocation5 + $0xf4] ss:$12 sps:$4 sm:$0xff]   ;;  %v2463_v37 = vld [vmem:[#allocation5 + $0x98] ss:$12 sps:$4 sm:$0xff]   ;;  %v2467_v38 = vld [vmem:[#allocation5 + $0x170] ss:$12 sps:$4 sm:$0xff]   ;;  %v1987_v46 = vcombine.low %v81_v30, %v81_v30 }
  0x57   :  { %v2432_v39 = vld [vmem:[#allocation5 + $0x10c] ss:$12 sps:$4 sm:$0xff]   ;;  %v2434_v40 = vld [vmem:[#allocation5 + $0x108] ss:$12 sps:$4 sm:$0xff]   ;;  %v2468_v41 = vld [vmem:[#allocation5 + $0xb0] ss:$12 sps:$4 sm:$0xff]  }
  0x58   :  { %1254 = vmatpush1.bf16.msra.mxu0 %v2408_v7  ;;  %2201 = vmatpush3.bf16.msra.mxu1 %v2441_v19  ;;  %v2472_v42 = vld [vmem:[#allocation5 + $0x248] ss:$12 sps:$4 sm:$0xff]   ;;  %v2437_v43 = vld [vmem:[#allocation5 + $0x124] ss:$12 sps:$4 sm:$0xff]   ;;  %v2439_v44 = vld [vmem:[#allocation5 + $0x120] ss:$12 sps:$4 sm:$0xff]  }
  0x59   :  { %1255 = vmatprep.subr.bf16.mxu0 %v2409_v8  ;;  %2202 = vmatprep.subr.bf16.mxu1 %v2445_v21  ;;  %v2473_v45 = vld [vmem:[#allocation5 + $0x188] ss:$12 sps:$4 sm:$0xff]   ;;  %v2477_v47 = vld [vmem:[#allocation5 + $0x260] ss:$12 sps:$4 sm:$0xff]   ;;  %v2444_v50 = vld [vmem:[#allocation5 + $0x138] ss:$12 sps:$4 sm:$0xff]  }
  0x5a   :  { %1279 = vmatprep.mubr.bf16.mxu0 %v1988_v33  ;;  %1443 = vmatprep.mubr.bf16.mxu1 %v1988_v33  ;;  %v2442_v48 = vld [vmem:[#allocation5 + $0x13c] ss:$12 sps:$4 sm:$0xff]   ;;  %v2478_v49 = vld [vmem:[#allocation5 + $0x1a0] ss:$12 sps:$4 sm:$0xff]   ;;  %v2482_v51 = vld [vmem:[#allocation5 + $0x278] ss:$12 sps:$4 sm:$0xff]  }
  0x5b   :  { %v2447_v52 = vld [vmem:[#allocation5 + $0x154] ss:$12 sps:$4 sm:$0xff]   ;;  %v2449_v53 = vld [vmem:[#allocation5 + $0x150] ss:$12 sps:$4 sm:$0xff]   ;;  %v2483_v54 = vld [vmem:[#allocation5 + $0x1b8] ss:$12 sps:$4 sm:$0xff]  }
  0x5c   :  { %1256 = vmatpush1.bf16.msra.mxu0 %v2411_v9  ;;  %2203 = vmatpush3.bf16.msra.mxu1 %v2446_v22  ;;  %v2487_v55 = vld [vmem:[#allocation5 + $0x290] ss:$12 sps:$4 sm:$0xff]   ;;  %v2452_v56 = vld [vmem:[#allocation5 + $0x16c] ss:$12 sps:$4 sm:$0xff]   ;;  %v2454_v57 = vld [vmem:[#allocation5 + $0x168] ss:$12 sps:$4 sm:$0xff]  }
  0x5d   :  { %1257 = vmatprep.subr.bf16.mxu0 %v2412_v10  ;;  %2204 = vmatprep.subr.bf16.mxu1 %v2450_v25  ;;  %v2488_v58 = vld [vmem:[#allocation5 + $0x1d0] ss:$12 sps:$4 sm:$0xff]   ;;  %v2492_v59 = vld [vmem:[#allocation5 + $0x2a8] ss:$12 sps:$4 sm:$0xff]   ;;  %v2459_v61 = vld [vmem:[#allocation5 + $0x180] ss:$12 sps:$4 sm:$0xff]  }
  0x5e   :  { %v2461_v60 = vld [vmem:[#allocation5 + $0x184] ss:$12 sps:$4 sm:$0xff]   ;;  %v2493_v62 = vld [vmem:[#allocation5 + $0x1e8] ss:$12 sps:$4 sm:$0xff]   ;;  %v2497_v63 = vld [vmem:[#allocation5 + $0x2c0] ss:$12 sps:$4 sm:$0xff]  }
  0x5f   :  { %v2466_v0 = vld [vmem:[#allocation5 + $0x19c] ss:$12 sps:$4 sm:$0xff]   ;;  %v2464_v1 = vld [vmem:[#allocation5 + $0x198] ss:$12 sps:$4 sm:$0xff]   ;;  %v2498_v2 = vld [vmem:[#allocation5 + $0x200] ss:$12 sps:$4 sm:$0xff]  }
  0x60   :  { %1258 = vmatpush1.bf16.msra.mxu0 %v2414_v13  ;;  %2205 = vmatpush3.bf16.msra.mxu1 %v2451_v27  ;;  %v2502_v3 = vld [vmem:[#allocation5 + $0x2d8] ss:$12 sps:$4 sm:$0xff]   ;;  %v2471_v4 = vld [vmem:[#allocation5 + $0x1b4] ss:$12 sps:$4 sm:$0xff]   ;;  %v82_v5 = vld [vmem:[#allocation2 + $0x8] sm:$0xff]  ;;  %s2789_s30 = smov [#allocation10]  }
  0x61   :  { %1259 = vmatprep.subr.bf16.mxu0 %v2415_v16  ;;  %2206 = vmatprep.subr.bf16.mxu1 %v2455_v29  ;;  %v1990_v6 = vcombine.high %v82_v5, %v82_v5  ;;  %v2503_v7 = vld [vmem:[#allocation5 + $0x218] ss:$12 sps:$4 sm:$0xff]   ;;  %v2469_v8 = vld [vmem:[#allocation5 + $0x1b0] ss:$12 sps:$4 sm:$0xff]   ;;  %v2474_v11 = vld [vmem:[#allocation5 + $0x1c8] ss:$12 sps:$4 sm:$0xff]   ;;  %v2878_v15 = vcombine.low %v82_v5, %v82_v5 }
  0x62   :  { %v2507_v9 = vld [vmem:[#allocation5 + $0x2f0] ss:$12 sps:$4 sm:$0xff]   ;;  %v2476_v10 = vld [vmem:[#allocation5 + $0x1cc] ss:$12 sps:$4 sm:$0xff]   ;;  %v2514_v13 = vld [vmem:[#allocation5 + $0x3c8] ss:$12 sps:$4 sm:$0xff]  }
  0x63   :  { %v2508_v12 = vld [vmem:[#allocation5 + $0x230] ss:$12 sps:$4 sm:$0xff]   ;;  %v2479_v16 = vld [vmem:[#allocation5 + $0x1e0] ss:$12 sps:$4 sm:$0xff]   ;;  %v2524_v22 = vld [vmem:[#allocation5 + $0x3f8] ss:$12 sps:$4 sm:$0xff]  }
  0x64   :  { %1260 = vmatpush1.bf16.msra.mxu0 %v2417_v17  ;;  %2207 = vmatpush3.bf16.msra.mxu1 %v2456_v32  ;;  %v2481_v14 = vld [vmem:[#allocation5 + $0x1e4] ss:$12 sps:$4 sm:$0xff]   ;;  %v2515_v17 = vld [vmem:[#allocation5 + $0x308] ss:$12 sps:$4 sm:$0xff]   ;;  %v2519_v18 = vld [vmem:[#allocation5 + $0x3e0] ss:$12 sps:$4 sm:$0xff]  }
  0x65   :  { %1261 = vmatprep.subr.bf16.mxu0 %v2418_v20  ;;  %2208 = vmatprep.subr.bf16.mxu1 %v2462_v34  ;;  %v2486_v19 = vld [vmem:[#allocation5 + $0x1fc] ss:$12 sps:$4 sm:$0xff]   ;;  %v2484_v20 = vld [vmem:[#allocation5 + $0x1f8] ss:$12 sps:$4 sm:$0xff]   ;;  %v2520_v21 = vld [vmem:[#allocation5 + $0x320] ss:$12 sps:$4 sm:$0xff]  }
  0x66   :  { %v2525_v25 = vld [vmem:[#allocation5 + $0x338] ss:$12 sps:$4 sm:$0xff]   ;;  %v2494_v29 = vld [vmem:[#allocation5 + $0x228] ss:$12 sps:$4 sm:$0xff]   ;;  %v2499_v32 = vld [vmem:[#allocation5 + $0x240] ss:$12 sps:$4 sm:$0xff]  }
  0x67   :  { %v2496_v27 = vld [vmem:[#allocation5 + $0x22c] ss:$12 sps:$4 sm:$0xff]   ;;  %v2534_v30 = vld [vmem:[#allocation5 + $0x428] ss:$12 sps:$4 sm:$0xff]   ;;  %v2551_v5 = vld [vmem:[#allocation5 + $0x330] ss:$12 sps:$4 sm:$0xff]  }
  0x68   :  { %1262 = vmatpush1.bf16.msra.mxu0 %v2420_v23  ;;  %2209 = vmatpush3.bf16.msra.mxu1 %v2463_v37  ;;  %v2491_v23 = vld [vmem:[#allocation5 + $0x214] ss:$12 sps:$4 sm:$0xff]   ;;  %s1976_s8 = sshll.u32 %s2789_s30, 4  ;;  %s1977_s8 = int_to_ptr.vmem [resolvable:$true] %s1976_s8 }
  0x69   :  { %1263 = vmatprep.subr.bf16.mxu0 %v2421_v24  ;;  %2210 = vmatprep.subr.bf16.mxu1 %v2467_v38  ;;  %v2489_v24 = vld [vmem:[#allocation5 + $0x210] ss:$12 sps:$4 sm:$0xff]   ;;  %v2535_v33 = vld [vmem:[#allocation5 + $0x368] ss:$12 sps:$4 sm:$0xff]   ;;  %v2539_v34 = vld [vmem:[#allocation5 + $0x440] ss:$12 sps:$4 sm:$0xff]   ;;  %p2753_p5 = scmp.lt.s32.totalorder %s1977_s8, %s1977_s8 }
  0x6a   :  { %v2504_v38 = vld [vmem:[#allocation5 + $0x258] ss:$12 sps:$4 sm:$0xff]  }
  0x6c   :  { %1264 = vmatpush1.bf16.msra.mxu0 %v2423_v26  ;;  %2211 = vmatpush3.bf16.msra.mxu1 %v2468_v41  ;;  %v2529_v26 = vld [vmem:[#allocation5 + $0x410] ss:$12 sps:$4 sm:$0xff]   ;;  %v2511_v41 = vld [vmem:[#allocation5 + $0x274] ss:$12 sps:$4 sm:$0xff]  }
  0x6d   :  { %1265 = vmatprep.subr.bf16.mxu0 %v2424_v28  ;;  %2218 = vmatprep.subr.bf16.mxu1 %v2472_v42  ;;  %v2530_v28 = vld [vmem:[#allocation5 + $0x350] ss:$12 sps:$4 sm:$0xff]  }
  0x6e   :  { %v2509_v42 = vld [vmem:[#allocation5 + $0x270] ss:$12 sps:$4 sm:$0xff]  }
  0x6f   :  { %1444 = vmatmul.mubr.bf16.vlgmr.msra.gmra.mrb[0].mxu1 %v1987_v46 }
  0x70   :  { %1266 = vmatpush1.bf16.msra.mxu0 %v2426_v31  ;;  %2219 = vmatpush3.bf16.msra.mxu1 %v2473_v45  ;;  %v2501_v31 = vld [vmem:[#allocation5 + $0x244] ss:$12 sps:$4 sm:$0xff]   ;;  %v2518_v45 = vld [vmem:[#allocation5 + $0x28c] ss:$12 sps:$4 sm:$0xff]  }
  0x71   :  { %1267 = vmatprep.subr.bf16.mxu0 %v2427_v35  ;;  %2220 = vmatprep.subr.bf16.mxu1 %v2477_v47  ;;  %v83_v35 = vld [vmem:[#allocation2 + $0x10] sm:$0xff] }
  0x72   :  { %1483 = vmatprep.mubr.bf16.mxu1 %v1990_v6  ;;  %v2881_v37 = vcombine.high %v83_v35, %v83_v35  ;;  %v2516_v47 = vld [vmem:[#allocation5 + $0x288] ss:$12 sps:$4 sm:$0xff]  }
  0x74   :  { %1268 = vmatpush1.bf16.msra.mxu0 %v2429_v36  ;;  %2221 = vmatpush3.bf16.msra.mxu1 %v2478_v49  ;;  %v2506_v36 = vld [vmem:[#allocation5 + $0x25c] ss:$12 sps:$4 sm:$0xff]   ;;  %v2884_v49 = vcombine.low %v83_v35, %v83_v35  ;;  %v2606_v35 = vld [vmem:[#allocation5 + $0x484] ss:$12 sps:$4 sm:$0xff]  }
  0x75   :  { %1269 = vmatprep.subr.bf16.mxu0 %v2432_v39  ;;  %2222 = vmatprep.subr.bf16.mxu1 %v2482_v51  ;;  %v2540_v39 = vld [vmem:[#allocation5 + $0x380] ss:$12 sps:$4 sm:$0xff]  }
  0x76   :  { %v2521_v51 = vld [vmem:[#allocation5 + $0x2a0] ss:$12 sps:$4 sm:$0xff]  }
  0x78   :  { %1270 = vmatpush1.bf16.msra.mxu0 %v2434_v40  ;;  %2223 = vmatpush3.bf16.msra.mxu1 %v2483_v54  ;;  %v2544_v40 = vld [vmem:[#allocation5 + $0x458] ss:$12 sps:$4 sm:$0xff]   ;;  %v2560_v54 = vld [vmem:[#allocation5 + $0x4a0] ss:$12 sps:$4 sm:$0xff]  }
  0x79   :  { %1271 = vmatprep.subr.bf16.mxu0 %v2437_v43  ;;  %2224 = vmatprep.subr.bf16.mxu1 %v2487_v55  ;;  %v2545_v43 = vld [vmem:[#allocation5 + $0x398] ss:$12 sps:$4 sm:$0xff]  }
  0x7a   :  { %v2526_v55 = vld [vmem:[#allocation5 + $0x2b8] ss:$12 sps:$4 sm:$0xff]  }
  0x7c   :  { %1272 = vmatpush1.bf16.msra.mxu0 %v2439_v44  ;;  %2225 = vmatpush3.bf16.msra.mxu1 %v2488_v58  ;;  %v2549_v44 = vld [vmem:[#allocation5 + $0x470] ss:$12 sps:$4 sm:$0xff]  }
  0x7d   :  { %1273 = vmatprep.subr.bf16.mxu0 %v2442_v48  ;;  %2226 = vmatprep.subr.bf16.mxu1 %v2492_v59  ;;  %v2523_v48 = vld [vmem:[#allocation5 + $0x2a4] ss:$12 sps:$4 sm:$0xff]   ;;  %v2538_v59 = vld [vmem:[#allocation5 + $0x2ec] ss:$12 sps:$4 sm:$0xff]  }
  0x7e   :  { %v2531_v58 = vld [vmem:[#allocation5 + $0x2d0] ss:$12 sps:$4 sm:$0xff]  }
  0x80   :  { %1274 = vmatpush1.bf16.msra.mxu0 %v2444_v50  ;;  %2227 = vmatpush3.bf16.msra.mxu1 %v2493_v62  ;;  %v2556_v50 = vld [vmem:[#allocation5 + $0x488] ss:$12 sps:$4 sm:$0xff]   ;;  %v2543_v62 = vld [vmem:[#allocation5 + $0x304] ss:$12 sps:$4 sm:$0xff]  }
  0x81   :  { %1275 = vmatprep.subr.bf16.mxu0 %v2447_v52  ;;  %2228 = vmatprep.subr.bf16.mxu1 %v2497_v63  ;;  %v2786_v52 = vmov 0.0   ;;  %v2572_v63 = vld [vmem:[#allocation5 + $0x4e8] ss:$12 sps:$4 sm:$0xff]  }
  0x84   :  { %1276 = vmatpush1.bf16.msra.mxu0 %v2449_v53  ;;  %2229 = vmatpush3.bf16.msra.mxu1 %v2498_v2  ;;  %v2528_v53 = vld [vmem:[#allocation5 + $0x2bc] ss:$12 sps:$4 sm:$0xff]   ;;  %v2576_v2 = vld [vmem:[#allocation5 + $0x500] ss:$12 sps:$4 sm:$0xff]  }
  0x85   :  { %1277 = vmatprep.subr.bf16.mxu0 %v2452_v56  ;;  %2230 = vmatprep.subr.bf16.mxu1 %v2502_v3  ;;  %v2533_v56 = vld [vmem:[#allocation5 + $0x2d4] ss:$12 sps:$4 sm:$0xff]   ;;  %v2546_v3 = vld [vmem:[#allocation5 + $0x318] ss:$12 sps:$4 sm:$0xff]  }
  0x88   :  { %1278 = vmatpush1.bf16.msra.mxu0 %v2454_v57  ;;  %2231 = vmatpush3.bf16.msra.mxu1 %v2503_v7  ;;  %v2564_v57 = vld [vmem:[#allocation5 + $0x4b8] ss:$12 sps:$4 sm:$0xff]  }
  0x89   :  { %1288 = vmatprep.subr.bf16.mxu0 %v2461_v60  ;;  %2232 = vmatprep.subr.bf16.mxu1 %v2507_v9  ;;  %v2568_v60 = vld [vmem:[#allocation5 + $0x4d0] ss:$12 sps:$4 sm:$0xff]   ;;  %v2580_v7 = vld [vmem:[#allocation5 + $0x518] ss:$12 sps:$4 sm:$0xff]   ;;  %v2557_v9 = vld [vmem:[#allocation5 + $0x348] ss:$12 sps:$4 sm:$0xff]  }
  0x8b   :  { %1280 = vmatmul.mubr.bf16.vlgmr.msra.gmra.mrb[0].mxu0 %v1987_v46  ;;  %v2550_v46 = vld [vmem:[#allocation5 + $0x3b0] ss:$12 sps:$4 sm:$0xff]  }
  0x8c   :  { %1289 = vmatpush1.bf16.msra.mxu0 %v2459_v61  ;;  %1320 = vmatprep.mubr.bf16.mxu0 %v1990_v6  ;;  %v2536_v61 = vld [vmem:[#allocation5 + $0x2e8] ss:$12 sps:$4 sm:$0xff]   ;;  %v2559_v6 = vld [vmem:[#allocation5 + $0x34c] ss:$12 sps:$4 sm:$0xff]  }
  0x8d   :  { %1290 = vmatprep.subr.bf16.mxu0 %v2466_v0  ;;  %2233 = vmatpush3.bf16.msra.mxu1 %v2508_v12  ;;  %v2541_v0 = vld [vmem:[#allocation5 + $0x300] ss:$12 sps:$4 sm:$0xff]  }
  0x8e   :  { %2240 = vmatprep.subr.bf16.mxu1 %v2514_v13  ;;  %v2561_v12 = vld [vmem:[#allocation5 + $0x360] ss:$12 sps:$4 sm:$0xff]   ;;  %v2567_v13 = vld [vmem:[#allocation5 + $0x37c] ss:$12 sps:$4 sm:$0xff]  }
  0x90   :  { %1291 = vmatpush1.bf16.msra.mxu0 %v2464_v1  ;;  %1484 = vmatmul.mubr.bf16.vlgmr.msra.gmra.mrb[4].mxu1 %v2878_v15  ;;  %v2548_v1 = vld [vmem:[#allocation5 + $0x31c] ss:$12 sps:$4 sm:$0xff]  }
  0x91   :  { %1292 = vmatprep.subr.bf16.mxu0 %v2471_v4  ;;  %2241 = vmatpush3.bf16.msra.mxu1 %v2515_v17  ;;  %v2553_v4 = vld [vmem:[#allocation5 + $0x334] ss:$12 sps:$4 sm:$0xff]   ;;  %v2575_v17 = vld [vmem:[#allocation5 + $0x3ac] ss:$12 sps:$4 sm:$0xff]  }
  0x92   :  { %2242 = vmatprep.subr.bf16.mxu1 %v2519_v18  ;;  %1523 = vmatprep.mubr.bf16.mxu1 %v2881_v37  ;;  %v2573_v18 = vld [vmem:[#allocation5 + $0x3a8] ss:$12 sps:$4 sm:$0xff]  }
  0x94   :  { %1293 = vmatpush1.bf16.msra.mxu0 %v2469_v8  ;;  %v2584_v8 = vld [vmem:[#allocation5 + $0x530] ss:$12 sps:$4 sm:$0xff]  }
  0x95   :  { %1294 = vmatprep.subr.bf16.mxu0 %v2476_v10  ;;  %2243 = vmatpush3.bf16.msra.mxu1 %v2520_v21  ;;  %v2563_v10 = vld [vmem:[#allocation5 + $0x364] ss:$12 sps:$4 sm:$0xff]   ;;  %v2583_v21 = vld [vmem:[#allocation5 + $0x3dc] ss:$12 sps:$4 sm:$0xff]  }
  0x96   :  { %2244 = vmatprep.subr.bf16.mxu1 %v2524_v22  ;;  %v2581_v22 = vld [vmem:[#allocation5 + $0x3d8] ss:$12 sps:$4 sm:$0xff]  }
  0x98   :  { %1295 = vmatpush1.bf16.msra.mxu0 %v2474_v11  ;;  %v2899_v11 = vld [vmem:[#allocation2 + $0x18] ss:$0 sps:$4 sm:$0xff]  }
  0x99   :  { %1296 = vmatprep.subr.bf16.mxu0 %v2481_v14  ;;  %2245 = vmatpush3.bf16.msra.mxu1 %v2525_v25  ;;  %v2565_v14 = vld [vmem:[#allocation5 + $0x378] ss:$12 sps:$4 sm:$0xff]  }
  0x9a   :  { %2246 = vmatprep.subr.bf16.mxu1 %v2529_v26  ;;  %v2591_v25 = vld [vmem:[#allocation5 + $0x40c] ss:$12 sps:$4 sm:$0xff]   ;;  %v2589_v26 = vld [vmem:[#allocation5 + $0x408] ss:$12 sps:$4 sm:$0xff]  }
  0x9c   :  { %1297 = vmatpush1.bf16.msra.mxu0 %v2479_v16  ;;  %v2569_v16 = vld [vmem:[#allocation5 + $0x390] ss:$12 sps:$4 sm:$0xff]  }
  0x9d   :  { %1298 = vmatprep.subr.bf16.mxu0 %v2486_v19  ;;  %2247 = vmatpush3.bf16.msra.mxu1 %v2530_v28  ;;  %v2579_v19 = vld [vmem:[#allocation5 + $0x3c4] ss:$12 sps:$4 sm:$0xff]   ;;  %v2592_v28 = vld [vmem:[#allocation5 + $0x420] ss:$12 sps:$4 sm:$0xff]  }
  0x9e   :  { %2248 = vmatprep.subr.bf16.mxu1 %v2534_v30  ;;  %v2595_v30 = vld [vmem:[#allocation5 + $0x438] ss:$12 sps:$4 sm:$0xff]  }
  0xa0   :  { %1299 = vmatpush1.bf16.msra.mxu0 %v2484_v20  ;;  %v2577_v20 = vld [vmem:[#allocation5 + $0x3c0] ss:$12 sps:$4 sm:$0xff]  }
  0xa1   :  { %1300 = vmatprep.subr.bf16.mxu0 %v2491_v23  ;;  %2249 = vmatpush3.bf16.msra.mxu1 %v2535_v33  ;;  %v2587_v23 = vld [vmem:[#allocation5 + $0x3f4] ss:$12 sps:$4 sm:$0xff]   ;;  %v2603_v33 = vld [vmem:[#allocation5 + $0x46c] ss:$12 sps:$4 sm:$0xff]  }
  0xa2   :  { %2250 = vmatprep.subr.bf16.mxu1 %v2539_v34  ;;  %v2601_v34 = vld [vmem:[#allocation5 + $0x468] ss:$12 sps:$4 sm:$0xff]  }
  0xa4   :  { %1301 = vmatpush1.bf16.msra.mxu0 %v2489_v24  ;;  %v2585_v24 = vld [vmem:[#allocation5 + $0x3f0] ss:$12 sps:$4 sm:$0xff]  }
  0xa5   :  { %1302 = vmatprep.subr.bf16.mxu0 %v2496_v27  ;;  %2251 = vmatpush3.bf16.msra.mxu1 %v2540_v39  ;;  %v2594_v27 = vld [vmem:[#allocation5 + $0x424] ss:$12 sps:$4 sm:$0xff]   ;;  %v2788_v39 = vmov 0  }
  0xa6   :  { %2252 = vmatprep.subr.bf16.mxu1 %v2544_v40  ;;  %v2612_v40 = vld [vmem:[#allocation5 + $0x4b4] ss:$12 sps:$4 sm:$0xff]  }
  0xa8   :  { %1303 = vmatpush1.bf16.msra.mxu0 %v2494_v29  ;;  %v2597_v29 = vld [vmem:[#allocation5 + $0x43c] ss:$12 sps:$4 sm:$0xff]  }
  0xa9   :  { %1304 = vmatprep.subr.bf16.mxu0 %v2501_v31  ;;  %2253 = vmatpush3.bf16.msra.mxu1 %v2545_v43  ;;  %v2600_v31 = vld [vmem:[#allocation5 + $0x454] ss:$12 sps:$4 sm:$0xff]  }
  0xaa   :  { %2254 = vmatprep.subr.bf16.mxu1 %v2549_v44  ;;  %v2613_v43 = vld [vmem:[#allocation5 + $0x4c8] ss:$12 sps:$4 sm:$0xff]   ;;  %v2618_v44 = vld [vmem:[#allocation5 + $0x4e4] ss:$12 sps:$4 sm:$0xff]  }
  0xac   :  { %1305 = vmatpush1.bf16.msra.mxu0 %v2499_v32  ;;  %v2598_v32 = vld [vmem:[#allocation5 + $0x450] ss:$12 sps:$4 sm:$0xff]  }
  0xad   :  { %1306 = vmatprep.subr.bf16.mxu0 %v2506_v36  ;;  %2255 = vmatpush3.bf16.msra.mxu1 %v2550_v46  ;;  %v2604_v36 = vld [vmem:[#allocation5 + $0x480] ss:$12 sps:$4 sm:$0xff]   ;;  %v2621_v46 = vld [vmem:[#allocation5 + $0x4fc] ss:$12 sps:$4 sm:$0xff]  }
  0xae   :  { %2311 = vmatprep.subr.bf16.mxu1 %v2786_v52 }
  0xb0   :  { %1307 = vmatpush1.bf16.msra.mxu0 %v2504_v38  ;;  %1524 = vmatmul.mubr.bf16.vlgmr.msra.gmra.mrb[8].mxu1 %v2884_v49  ;;  %v2607_v38 = vld [vmem:[#allocation5 + $0x498] ss:$12 sps:$4 sm:$0xff]  }
  0xb1   :  { %1308 = vmatprep.subr.bf16.mxu0 %v2511_v41  ;;  %2312 = vmatpush3.bf16.msra.mxu1 %v2556_v50  ;;  %v2610_v41 = vld [vmem:[#allocation5 + $0x4b0] ss:$12 sps:$4 sm:$0xff]   ;;  %v2627_v50 = vld [vmem:[#allocation5 + $0x52c] ss:$12 sps:$4 sm:$0xff]  }
  0xb2   :  { %2327 = vmatprep.mubr.msk.bf16.mxu1 %vm2787_vm0, %v2786_v52  ;;  %2313 = vmatprep.subr.bf16.mxu1 %v2786_v52 }
  0xb4   :  { %1309 = vmatpush1.bf16.msra.mxu0 %v2509_v42  ;;  %v2615_v42 = vld [vmem:[#allocation5 + $0x4cc] ss:$12 sps:$4 sm:$0xff]  }
  0xb5   :  { %1310 = vmatprep.subr.bf16.mxu0 %v2518_v45  ;;  %2314 = vmatpush3.bf16.msra.mxu1 %v2560_v54  ;;  %v2616_v45 = vld [vmem:[#allocation5 + $0x4e0] ss:$12 sps:$4 sm:$0xff]  }
  0xb6   :  { %2315 = vmatprep.subr.bf16.mxu1 %v2786_v52  ;;  %v2629_v54 = vld [vmem:[#allocation7] sm:$0xff]  }
  0xb8   :  { %1311 = vmatpush1.bf16.msra.mxu0 %v2516_v47  ;;  %v2619_v47 = vld [vmem:[#allocation5 + $0x4f8] ss:$12 sps:$4 sm:$0xff]  }
  0xb9   :  { %1312 = vmatprep.subr.bf16.mxu0 %v2523_v48  ;;  %2316 = vmatpush3.bf16.msra.mxu1 %v2564_v57  ;;  %v2624_v48 = vld [vmem:[#allocation5 + $0x514] ss:$12 sps:$4 sm:$0xff]  }
  0xba   :  { %2317 = vmatprep.subr.bf16.mxu1 %v2786_v52  ;;  %v2632_v57 = vld [vmem:[#allocation7 + $0x50] sm:$0xff]  }
  0xbc   :  { %1313 = vmatpush1.bf16.msra.mxu0 %v2521_v51  ;;  %v2625_v51 = vld [vmem:[#allocation5 + $0x528] ss:$12 sps:$4 sm:$0xff]  }
  0xbd   :  { %1314 = vmatprep.subr.bf16.mxu0 %v2528_v53  ;;  %2318 = vmatpush3.bf16.msra.mxu1 %v2568_v60  ;;  %v2628_v53 = vld [vmem:[#allocation7 + $0x40] sm:$0xff]   ;;  %v2635_v60 = vld [vmem:[#allocation7 + $0x18] sm:$0xff]  }
  0xbe   :  { %2319 = vmatprep.subr.bf16.mxu1 %v2786_v52 }
  0xc0   :  { %1315 = vmatpush1.bf16.msra.mxu0 %v2526_v55  ;;  %v2630_v55 = vld [vmem:[#allocation7 + $0x48] sm:$0xff]  }
  0xc1   :  { %1316 = vmatprep.subr.bf16.mxu0 %v2533_v56  ;;  %2320 = vmatpush3.bf16.msra.mxu1 %v2572_v63  ;;  %v2631_v56 = vld [vmem:[#allocation7 + $0x8] sm:$0xff]  }
  0xc2   :  { %2321 = vmatprep.subr.bf16.mxu1 %v2786_v52  ;;  %v2638_v63 = vld [vmem:[#allocation7 + $0x68] sm:$0xff]  }
  0xc4   :  { %1317 = vmatpush1.bf16.msra.mxu0 %v2531_v58  ;;  %v2633_v58 = vld [vmem:[#allocation7 + $0x10] sm:$0xff]  }
  0xc5   :  { %1318 = vmatprep.subr.bf16.mxu0 %v2538_v59  ;;  %2322 = vmatpush3.bf16.msra.mxu1 %v2576_v2  ;;  %v2634_v59 = vld [vmem:[#allocation7 + $0x58] sm:$0xff]  }
  0xc6   :  { %2323 = vmatprep.subr.bf16.mxu1 %v2786_v52 }
  0xc8   :  { %1319 = vmatpush1.bf16.msra.mxu0 %v2536_v61  ;;  %v2636_v61 = vld [vmem:[#allocation7 + $0x60] sm:$0xff]  }
  0xc9   :  { %1329 = vmatprep.subr.bf16.mxu0 %v2543_v62  ;;  %2324 = vmatpush3.bf16.msra.mxu1 %v2580_v7  ;;  %v2637_v62 = vld [vmem:[#allocation7 + $0x20] sm:$0xff]  }
  0xca   :  { %2325 = vmatprep.subr.bf16.mxu1 %v2786_v52 }
  0xcb   :  { %1321 = vmatmul.mubr.bf16.vlgmr.msra.gmra.mrb[0].mxu0 %v2878_v15  ;;  %v2571_v15 = vld [vmem:[#allocation5 + $0x394] ss:$12 sps:$4 sm:$0xff]  }
  0xcc   :  { %1330 = vmatpush1.bf16.msra.mxu0 %v2541_v0  ;;  %1361 = vmatprep.mubr.bf16.mxu0 %v2881_v37  ;;  %v2609_v37 = vld [vmem:[#allocation5 + $0x49c] ss:$12 sps:$4 sm:$0xff]  }
  0xcd   :  { %1331 = vmatprep.subr.bf16.mxu0 %v2548_v1  ;;  %2326 = vmatpush3.bf16.msra.mxu1 %v2584_v8  ;;  %v2639_v0 = vld [vmem:[#allocation7 + $0x28] sm:$0xff]  }
  0xce   :  { %2271 = vmatprep.subr.bf16.mxu1 %v2628_v53  ;;  %v2649_v53 = vld [vmem:[#allocation7 + $0xa8] sm:$0xff]  }
  0xd0   :  { %1332 = vmatpush1.bf16.msra.mxu0 %v2546_v3  ;;  %2328 = vmatmul.mubr.bf16.vlgmr.msra.gmra.mrb[12].mxu1 %v2899_v11 }
  0xd1   :  { %1333 = vmatprep.subr.bf16.mxu0 %v2553_v4  ;;  %2272 = vmatpush3.bf16.msra.mxu1 %v2629_v54  ;;  %v2650_v54 = vld [vmem:[#allocation7 + $0xb0] sm:$0xff]  }
  0xd2   :  { %2273 = vmatprep.subr.bf16.mxu1 %v2630_v55  ;;  %v2651_v55 = vld [vmem:[#allocation7 + $0xb8] sm:$0xff]  }
  0xd4   :  { %1334 = vmatpush1.bf16.msra.mxu0 %v2551_v5 }
  0xd5   :  { %1335 = vmatprep.subr.bf16.mxu0 %v2559_v6  ;;  %2274 = vmatpush3.bf16.msra.mxu1 %v2631_v56  ;;  %v311_v6 = vlaneseq }
  0xd6   :  { %2275 = vmatprep.subr.bf16.mxu1 %v2632_v57 }
  0xd7   :  { %v312_v7 = vshrl.u32 %v311_v6, 7 }
  0xd8   :  { %1336 = vmatpush1.bf16.msra.mxu0 %v2557_v9  ;;  %v309_v9 = vld [vmem:[%s2947_s2] sm:$0x7] }
  0xd9   :  { %1337 = vmatprep.subr.bf16.mxu0 %v2563_v10  ;;  %2276 = vmatpush3.bf16.msra.mxu1 %v2633_v58  ;;  %v321_v8 = vsub.s32 2, %v312_v7  ;;  %v2652_v58 = vld [vmem:[#allocation8] sm:$0xff]  }
  0xda   :  { %2277 = vmatprep.subr.bf16.mxu1 %v2634_v59  ;;  %v2653_v59 = vld [vmem:[#allocation8 + $0x8] sm:$0xff]  }
  0xdb   :  { %v322_v10 = vrot.slane %v309_v9, %v321_v8 }
  0xdc   :  { %1338 = vmatpush1.bf16.msra.mxu0 %v2561_v12 }
  0xdd   :  { %1339 = vmatprep.subr.bf16.mxu0 %v2567_v13  ;;  %2278 = vmatpush3.bf16.msra.mxu1 %v2635_v60  ;;  %v2654_v60 = vld [vmem:[#allocation8 + $0x10] sm:$0xff]  }
  0xde   :  { %2279 = vmatprep.subr.bf16.mxu1 %v2636_v61  ;;  %v2655_v61 = vld [vmem:[#allocation8 + $0x18] sm:$0xff]  }
  0xe0   :  { %1340 = vmatpush1.bf16.msra.mxu0 %v2565_v14 }
  0xe1   :  { %1341 = vmatprep.subr.bf16.mxu0 %v2571_v15  ;;  %2280 = vmatpush3.bf16.msra.mxu1 %v2637_v62  ;;  %v2656_v62 = vld [vmem:[#allocation8 + $0x20] sm:$0xff]  }
  0xe2   :  { %2281 = vmatprep.subr.bf16.mxu1 %v2638_v63  ;;  %v2657_v63 = vld [vmem:[#allocation8 + $0x28] sm:$0xff]  }
  0xe4   :  { %1342 = vmatpush1.bf16.msra.mxu0 %v2569_v16 }
  0xe5   :  { %1343 = vmatprep.subr.bf16.mxu0 %v2575_v17  ;;  %2282 = vmatpush3.bf16.msra.mxu1 %v2639_v0  ;;  %v2658_v0 = vld [vmem:[#allocation8 + $0x30] sm:$0xff]  }
  0xe8   :  { %1344 = vmatpush1.bf16.msra.mxu0 %v2573_v18  ;;  %v2640_v18 = vld [vmem:[#allocation7 + $0x70] sm:$0xff]  }
  0xe9   :  { %1345 = vmatprep.subr.bf16.mxu0 %v2579_v19  ;;  %v2641_v19 = vld [vmem:[#allocation7 + $0x30] sm:$0xff]   ;;  %2283 = vmatprep.subr.bf16.mxu1 %v2640_v18 }
  0xea   :  { %2284 = vmatpush3.bf16.msra.mxu1 %v2641_v19 }
  0xec   :  { %1346 = vmatpush1.bf16.msra.mxu0 %v2577_v20  ;;  %v2642_v20 = vld [vmem:[#allocation7 + $0x78] sm:$0xff]  }
  0xed   :  { %1347 = vmatprep.subr.bf16.mxu0 %v2583_v21  ;;  %v2643_v21 = vld [vmem:[#allocation7 + $0x38] sm:$0xff]   ;;  %2285 = vmatprep.subr.bf16.mxu1 %v2642_v20 }
  0xee   :  { %2286 = vmatpush3.bf16.msra.mxu1 %v2643_v21 }
  0xef   :  { %2331 = vmatprep.subr.bf16.mxu1 %v2786_v52 }
  0xf0   :  { %1348 = vmatpush1.bf16.msra.mxu0 %v2581_v22 }
  0xf1   :  { %1349 = vmatprep.subr.bf16.mxu0 %v2587_v23 }
  0xf4   :  { %1350 = vmatpush1.bf16.msra.mxu0 %v2585_v24 }
  0xf5   :  { %1351 = vmatprep.subr.bf16.mxu0 %v2591_v25 }
  0xf8   :  { %1352 = vmatpush1.bf16.msra.mxu0 %v2589_v26 }
  0xf9   :  { %1353 = vmatprep.subr.bf16.mxu0 %v2594_v27 }
  0xfc   :  { %1354 = vmatpush1.bf16.msra.mxu0 %v2592_v28 }
  0xfd   :  { %1355 = vmatprep.subr.bf16.mxu0 %v2597_v29 }
 0x100   :  { %1356 = vmatpush1.bf16.msra.mxu0 %v2595_v30 }
 0x101   :  { %1357 = vmatprep.subr.bf16.mxu0 %v2600_v31 }
 0x104   :  { %1358 = vmatpush1.bf16.msra.mxu0 %v2598_v32 }
 0x105   :  { %1359 = vmatprep.subr.bf16.mxu0 %v2603_v33  ;;  %v313_v33 = vsub.s32 0, %v312_v7 }
 0x108   :  { %1360 = vmatpush1.bf16.msra.mxu0 %v2601_v34  ;;  %v317_v34 = vsub.s32 1, %v312_v7  ;;  %v2162_v7 = vld [vmem:[%s2949_s4] ss:$0 sm:$0xff]  ;;  %s2748_s4 = scalar_lea.vmem %s1977_s8, 128 }
 0x109   :  { %1370 = vmatprep.subr.bf16.mxu0 %v2606_v35  ;;  %v314_v35 = vrot.slane %v309_v9, %v313_v33  ;;  %p2749_p4 = scmp.ne.s32.totalorder %s1977_s8, %s2748_s4  ;;  %p2754_p6 = scmp.lt.s32.totalorder %s2748_s4, %s2748_s4 }
 0x10b   :  { %1362 = vmatmul.mubr.bf16.vlgmr.msra.gmra.mrb[0].mxu0 %v2884_v49  ;;  %v2622_v49 = vld [vmem:[#allocation5 + $0x510] ss:$12 sps:$4 sm:$0xff]   ;;  %p2755_p7 = por %p2754_p6, %p2753_p5 }
 0x10c   :  { %1371 = vmatpush1.bf16.msra.mxu0 %v2604_v36  ;;  %1402 = vmatprep.mubr.bf16.mxu0 %v2788_v39  ;;  %v318_v36 = vrot.slane %v309_v9, %v317_v34 }
 0x10d   :  { %1372 = vmatprep.subr.bf16.mxu0 %v2609_v37  ;;  %p2756_p8 = pnand %p2755_p7, %p2749_p4 }
 0x110   :  { %1373 = vmatpush1.bf16.msra.mxu0 %v2607_v38 }
 0x111   :  { %1374 = vmatprep.subr.bf16.mxu0 %v2612_v40 }
 0x114   :  { %1375 = vmatpush1.bf16.msra.mxu0 %v2610_v41 }
 0x115   :  { %1376 = vmatprep.subr.bf16.mxu0 %v2615_v42 }
 0x118   :  { %1377 = vmatpush1.bf16.msra.mxu0 %v2613_v43 }
 0x119   :  { %1378 = vmatprep.subr.bf16.mxu0 %v2618_v44 }
 0x11c   :  { %1379 = vmatpush1.bf16.msra.mxu0 %v2616_v45 }
 0x11d   :  { %1380 = vmatprep.subr.bf16.mxu0 %v2621_v46  ;;  %v2644_v46 = vld [vmem:[#allocation7 + $0x80] sm:$0xff]  }
 0x120   :  { %1381 = vmatpush1.bf16.msra.mxu0 %v2619_v47 }
 0x121   :  { %1382 = vmatprep.subr.bf16.mxu0 %v2624_v48  ;;  %v2645_v48 = vld [vmem:[#allocation7 + $0x88] sm:$0xff]  }
 0x124   :  { %1383 = vmatpush1.bf16.msra.mxu0 %v2622_v49  ;;  %v2646_v49 = vld [vmem:[#allocation7 + $0x90] sm:$0xff]  }
 0x125   :  { %1384 = vmatprep.subr.bf16.mxu0 %v2627_v50  ;;  %v2647_v50 = vld [vmem:[#allocation7 + $0x98] sm:$0xff]  }
 0x128   :  { %1385 = vmatpush1.bf16.msra.mxu0 %v2625_v51  ;;  %v2648_v51 = vld [vmem:[#allocation7 + $0xa0] sm:$0xff]  }
 0x12b   :  { %1403 = vmatmul.mubr.bf16.vlgmr.msra.gmra.mrb[0].mxu0 %v2899_v11 }
 0x142   :  { %v2212_v1 = vpop.f32.mrb[0].mxu1 }
 0x143   :  { %v2213_v2 = vpop.f32.mrb[1].mxu1 }
 0x144   :  { %v2214_v3 = vadd.f32 %v2213_v2, %v2212_v1  ;;  %v2215_v4 = vpop.f32.mrb[2].mxu1  ;;  %v2659_v1 = vld [vmem:[#allocation8 + $0x38] sm:$0xff]  }
 0x145   :  { %v2216_v5 = vpop.f32.mrb[3].mxu1 }
 0x146   :  { %v1446_v11 = vadd.f32 %v2214_v3, %v322_v10 }
 0x163   :  { %v2234_v12 = vpop.f32.mrb[4].mxu1 }
 0x164   :  { %v2235_v13 = vpop.f32.mrb[5].mxu1 }
 0x165   :  { %v2236_v14 = vadd.f32 %v2235_v13, %v2234_v12  ;;  %v2237_v15 = vpop.f32.mrb[6].mxu1 }
 0x166   :  { %v2238_v16 = vpop.f32.mrb[7].mxu1 }
 0x167   :  { %v1486_v17 = vadd.f32 %v2236_v14, %v1446_v11 }
 0x183   :  { %v2256_v22 = vpop.f32.mrb[8].mxu1 }
 0x184   :  { %v2257_v23 = vpop.f32.mrb[9].mxu1 }
 0x185   :  { %v2258_v24 = vadd.f32 %v2257_v23, %v2256_v22  ;;  %v2259_v25 = vpop.f32.mrb[10].mxu1 }
 0x186   :  { %v2260_v26 = vpop.f32.mrb[11].mxu1 }
 0x187   :  { %v1526_v27 = vadd.f32 %v2258_v24, %v1486_v17 }
 0x1a3   :  { %v1565_v28 = vpop.f32.mrb[12].mxu1 }
 0x1a4   :  { %v1566_v29 = vadd.f32 %v1565_v28, %v1526_v27  ;;  %v2329_v30 = vpop.f32.mrb[13].mxu1 }
 0x1a5   :  { %v1568_v31 = vpop.f32.mrb[14].mxu1 }
 0x1a6   :  { %v2330_v32 = vpop.f32.mrb[15].mxu1  ;;  %v1573_v56 = vmax.f32 %v1566_v29, 0.0 }
 0x1a8   :  { %v1576_v57 = vpack.c.bf16 %v1573_v56, %v1573_v56 }
 0x1fe   :  { %v1404_v37 = vpop.f32.mrb[0].mxu0 }
 0x1ff   :  { %v2371_v38 = vadd.f32 %v1404_v37, %v314_v35  ;;  %v1406_v39 = vpop.f32.mrb[1].mxu0 }
 0x200   :  { %v2372_v40 = vadd.f32 %v1406_v39, %v318_v36  ;;  %v1408_v41 = vpop.f32.mrb[2].mxu0 }
 0x201   :  { %v1571_v42 = vmax.f32 %v2371_v38, 0.0  ;;  %v1409_v43 = vpop.f32.mrb[3].mxu0 }
 0x202   :  { %v1572_v44 = vmax.f32 %v2372_v40, 0.0 }
 0x203   :  { %v1574_v47 = vpack.c.bf16 %v1571_v42, %v1571_v42 }
 0x204   :  { %v1575_v45 = vpack.c.bf16 %v1572_v44, %v1572_v44 }
 0x206   :  { %1808 = vmatprep.mubr.bf16.mxu1 %v1575_v45 }
 0x207   :  { %1809 = vmatmul.mubr.bf16.vlgmr.msra.gmra.mrb[16].mxu1 %v1574_v47 }
 0x208   :  { %2332 = vmatpush3.bf16.msra.mxu1 %v2644_v46  ;;  %2347 = vmatprep.mubr.msk.bf16.mxu1 %vm2787_vm0, %v2786_v52 }
 0x209   :  { %2333 = vmatprep.subr.bf16.mxu1 %v2786_v52 }
 0x20c   :  { %2334 = vmatpush3.bf16.msra.mxu1 %v2645_v48 }
 0x20d   :  { %2335 = vmatprep.subr.bf16.mxu1 %v2786_v52 }
 0x210   :  { %2336 = vmatpush3.bf16.msra.mxu1 %v2646_v49 }
 0x211   :  { %2337 = vmatprep.subr.bf16.mxu1 %v2786_v52 }
 0x214   :  { %2338 = vmatpush3.bf16.msra.mxu1 %v2647_v50 }
 0x215   :  { %2339 = vmatprep.subr.bf16.mxu1 %v2786_v52 }
 0x218   :  { %2340 = vmatpush3.bf16.msra.mxu1 %v2648_v51 }
 0x219   :  { %2341 = vmatprep.subr.bf16.mxu1 %v2786_v52 }
 0x21c   :  { %2342 = vmatpush3.bf16.msra.mxu1 %v2649_v53 }
 0x21d   :  { %2343 = vmatprep.subr.bf16.mxu1 %v2786_v52 }
 0x220   :  { %2344 = vmatpush3.bf16.msra.mxu1 %v2650_v54 }
 0x221   :  { %2345 = vmatprep.subr.bf16.mxu1 %v2786_v52 }
 0x224   :  { %2346 = vmatpush3.bf16.msra.mxu1 %v2651_v55 }
 0x225   :  { %2351 = vmatprep.subr.bf16.mxu1 %v2786_v52 }
 0x227   :  { %2348 = vmatmul.mubr.bf16.vlgmr.msra.gmra.mrb[20].mxu1 %v1576_v57 }
 0x228   :  { %2367 = vmatprep.mubr.msk.bf16.mxu1 %vm2787_vm0, %v2786_v52  ;;  %2352 = vmatpush3.bf16.msra.mxu1 %v2652_v58 }
 0x229   :  { %2353 = vmatprep.subr.bf16.mxu1 %v2786_v52 }
 0x22c   :  { %2354 = vmatpush3.bf16.msra.mxu1 %v2653_v59 }
 0x22d   :  { %2355 = vmatprep.subr.bf16.mxu1 %v2786_v52 }
 0x230   :  { %2356 = vmatpush3.bf16.msra.mxu1 %v2654_v60 }
 0x231   :  { %2357 = vmatprep.subr.bf16.mxu1 %v2786_v52 }
 0x234   :  { %2358 = vmatpush3.bf16.msra.mxu1 %v2655_v61 }
 0x235   :  { %2359 = vmatprep.subr.bf16.mxu1 %v2786_v52 }
 0x238   :  { %2360 = vmatpush3.bf16.msra.mxu1 %v2656_v62 }
 0x239   :  { %2361 = vmatprep.subr.bf16.mxu1 %v2786_v52 }
 0x23c   :  { %2362 = vmatpush3.bf16.msra.mxu1 %v2657_v63 }
 0x23d   :  { %2363 = vmatprep.subr.bf16.mxu1 %v2786_v52 }
 0x240   :  { %2364 = vmatpush3.bf16.msra.mxu1 %v2658_v0 }
 0x241   :  { %2365 = vmatprep.subr.bf16.mxu1 %v2786_v52  ;;  %v2187_v52 = vld [vmem:[%s2951_s6] ss:$0 sm:$0xff] }
 0x244   :  { %2366 = vmatpush3.bf16.msra.mxu1 %v2659_v1 }
 0x2da   :  { %v2287_v2 = vpop.f32.mrb[16].mxu1 }
 0x2db   :  { %v2288_v3 = vpop.f32.mrb[17].mxu1 }
 0x2dc   :  { %v2289_v4 = vadd.f32 %v2288_v3, %v2287_v2  ;;  %v2290_v5 = vpop.f32.mrb[18].mxu1 }
 0x2dd   :  { %v2291_v6 = vpop.f32.mrb[19].mxu1 }
 0x2de   :  { %v1811_v8 = vadd.f32 %v2289_v4, %v2162_v7 }
 0x2fa   :  { %v1850_v9 = vpop.f32.mrb[20].mxu1 }
 0x2fb   :  { %v1851_v10 = vadd.f32 %v1850_v9, %v1811_v8  ;;  %v2349_v11 = vpop.f32.mrb[21].mxu1 }
 0x2fc   :  { %v1853_v12 = vpop.f32.mrb[22].mxu1 }
 0x2fd   :  { %v1856_v13 = vmax.f32 %v1851_v10, 0.0  ;;  %v2350_v14 = vpop.f32.mrb[23].mxu1 }
 0x2ff   :  { %v1857_v15 = vpack.c.bf16 %v1856_v13, %v1856_v13 }
 0x301   :  { %2368 = vmatmul.mubr.bf16.vlgmr.msra.gmra.mrb[24].mxu1 %v1857_v15 }
 0x3d4   :  { %v1963_v16 = vpop.f32.mrb[24].mxu1 }
 0x3d5   :  { %v1964_v17 = vadd.f32 %v2187_v52, %v1963_v16  ;;  %v2369_v18 = vpop.f32.mrb[25].mxu1 }
 0x3d6   :  { %v1966_v19 = vpop.f32.mrb[26].mxu1 }
 0x3d7   :  { %1969 = vst [vmem:[#allocation10] sm:$0xff] %v1964_v17  ;;  %v2370_v20 = vpop.f32.mrb[27].mxu1 }
 0x3d8   :  { %2759 = shalt.err (!%p2756_p8)
}
 0x3d9   :  { %s2760_s6 = scalar_lea.hbm %s2952_s7, 128 }
 0x3da   :  { %p2761_p9 = scmp.ne.s32.totalorder %s2952_s7, %s2760_s6  ;;  %p2764_p10 = scmp.lt.u32.totalorder %s2760_s6, %s2952_s7 }
 0x3dc   :  { %p2766_p11 = pnand %p2764_p10, %p2761_p9 }
 0x3de   :  { %2769 = shalt.err (!%p2766_p11)
}
 0x3df   :  { %1979 = dma.vmem_to_hbm [thread:$0]  %s1977_s8, 128, %s2952_s7, [#allocation4]  }
 0x3e0   :  { %2776 = dma.done.wait [#allocation4], 128  }
 0x3e1   :  { %2777 = vsyncadd [#allocation4], 4294967168 }
 0x3e2   :  { %1983 = vsyncpa [#allocation3], 1 }
 0x3e3   :  { %1984 = vsyncpa [#allocation6], 1 }
 0x3e4   :  { %1985 = vsyncpa [#allocation9], 1 }
 0x3e5   :  { %1986 = vsyncpa [#allocation4], 1 }

</bundles_post_ra>
